<compile_context>
chip_gen: v5e
topology: v5e:2x2
jax: 0.10.0
libtpu: 0.0.40
codegen_flags: <defaults>
</compile_context>

<pallas_src>
import functools

import jax
import jax.numpy as jnp
from jax.experimental import pallas as pl
from jax.experimental.pallas import tpu as pltpu


def _round_up(x, m):
    return ((x + m - 1) // m) * m


# ---------------------------------------------------------------------------
# Per-generation tiling / VMEM configuration.
# ---------------------------------------------------------------------------
def _tpu_config():
    """(tm, tff, vmem_cap_bytes, num_cores) for the local TPU generation.

    tm sets the FLOP/weight-byte intensity; crossovers are roughly
    v5e ~240, v7x ~310, v6e ~700 FLOP/byte.
    """
    kind = ""
    try:
        kind = jax.devices()[0].device_kind.lower()
    except Exception:
        pass

    if "v7" in kind:
        tm, tff, cap, cores = 512, 512, 56 << 20, 2     # 64 MiB VMEM/TC, 2 TCs
    elif "v6" in kind:
        tm, tff, cap, cores = 1024, 1024, 96 << 20, 1   # 128 MiB VMEM
    elif "v5" in kind:
        tm, tff, cap, cores = 256, 512, 64 << 20, 1     # already ~balanced
    else:
        tm, tff, cap, cores = 256, 512, 48 << 20, 1     # conservative fallback

    try:
        vmem_cap = int(pltpu.get_tpu_info().vmem_capacity_bytes)
        cap = min(cap, int(vmem_cap * 0.85))
    except Exception:
        pass
    return tm, tff, cap, cores


# ---------------------------------------------------------------------------
# Kernel.
# ---------------------------------------------------------------------------
def ffn_kernel(x_ref, w1_ref, b1_ref, w2_ref, b2_ref, o_ref):
    # x_ref:  (tm, dim_p)   f32   row tile, resident over the ff axis
    # w1_ref: (dim_p, tff)  bf16  w1 slab
    # b1_ref: (1, tff)      f32
    # w2_ref: (tff, dim_p)  bf16  w2 slab
    # b2_ref: (1, dim_p)    f32
    # o_ref:  (tm, dim_p)   f32   output tile, resident over the ff axis
    #                             (doubles as the accumulator)
    j = pl.program_id(1)

    @pl.when(j == 0)
    def _():
        o_ref[...] = jnp.zeros_like(o_ref)

    # In-kernel f32->bf16 cast of x (VPU filler under an MXU-bound schedule;
    # avoids a separate wrapper-side HBM cast pass).
    x_bf = x_ref[...].astype(jnp.bfloat16)

    # First matmul slab: (tm, dim_p) @ (dim_p, tff), f32 accumulate on MXU.
    h = jnp.dot(x_bf, w1_ref[...], preferred_element_type=jnp.float32)
    h = jnp.maximum(h + b1_ref[...], 0.0)  # bias + ReLU (VPU)

    # Second matmul partial sum over this ff slab: (tm, tff) @ (tff, dim_p).
    # h is rounded to bf16 for the MXU bf16 rate (intentional precision trade).
    o_ref[...] += jnp.dot(h.astype(jnp.bfloat16), w2_ref[...],
                          preferred_element_type=jnp.float32)

    @pl.when(j == pl.num_programs(1) - 1)
    def _():
        o_ref[...] += b2_ref[...]


# ---------------------------------------------------------------------------
# Parameter packing (hoisted out of the hot path -- call once per weight set).
# ---------------------------------------------------------------------------
def pack_ffn_weights(w1, b1, w2, b2):
    """Pad feature dims to multiples of 128 and cast weights to bf16 once.
    w1: [dim, dim_ff], w2: [dim_ff, dim] (pre-transposed vs PyTorch)."""
    dim, dim_ff = w1.shape
    dim_p = _round_up(dim, 128)
    dff_p = _round_up(dim_ff, 128)
    w1_p = jnp.pad(w1, ((0, dim_p - dim), (0, dff_p - dim_ff))).astype(jnp.bfloat16)
    w2_p = jnp.pad(w2, ((0, dff_p - dim_ff), (0, dim_p - dim))).astype(jnp.bfloat16)
    b1_p = jnp.pad(b1, (0, dff_p - dim_ff)).astype(jnp.float32).reshape(1, dff_p)
    b2_p = jnp.pad(b2, (0, dim_p - dim)).astype(jnp.float32).reshape(1, dim_p)
    return w1_p, b1_p, w2_p, b2_p


# ---------------------------------------------------------------------------
# Wrapper.
# ---------------------------------------------------------------------------
@functools.partial(jax.jit,
                   static_argnames=("tm0", "tff0", "vmem_cap", "num_cores"))
def _ffn_call(x, w1_p, b1_p, w2_p, b2_p, *, tm0, tff0, vmem_cap, num_cores):
    B, S, d = x.shape
    N = B * S
    dim_p, dff_p = w1_p.shape

    # ---- ff slab tile: multiple of 128 that divides dff_p -------------------
    tff = min(tff0, dff_p)
    while dff_p % tff != 0:
        tff -= 128

    # ---- row tile: multiple of 16 (bf16 packed sublanes), small-N clamp -----
    tm = min(tm0, _round_up(N, 16))
    if num_cores >= 2:
        # Keep >= num_cores row tiles so the 'parallel' axis feeds both TCs.
        tm = min(tm, max(16, _round_up(-(-N // num_cores), 16)))

    # ---- VMEM budget (double-buffered blocks; no extra accumulator) ---------
    def blk_bytes(tm_, tff_):
        return (2 * tm_ * dim_p * 4        # x tile (f32, cast in-kernel)
                + 2 * dim_p * tff_ * 2     # w1 slab (bf16)
                + 2 * tff_ * 4             # b1 slab
                + 2 * tff_ * dim_p * 2     # w2 slab (bf16)
                + 2 * dim_p * 4            # b2
                + 2 * tm_ * dim_p * 4)     # out tile / accumulator (f32)

    while blk_bytes(tm, tff) > vmem_cap and tm > 128:
        tm = max(128, tm // 2)
    while blk_bytes(tm, tff) > vmem_cap and tff > 128:
        new_tff = tff - 128
        while dff_p % new_tff != 0 and new_tff > 128:
            new_tff -= 128
        if dff_p % new_tff != 0:
            break
        tff = new_tff

    n_p = _round_up(N, tm)
    grid = (n_p // tm, dff_p // tff)

    # Zero padding of rows / feature dims is a mathematical no-op.
    x2d = jnp.pad(x.reshape(N, d), ((0, n_p - N), (0, dim_p - d)))  # stays f32

    vmem_limit = int(min(max(int(blk_bytes(tm, tff) * 1.25), 32 << 20), vmem_cap))

    n_row_tiles = grid[0]
    cost = pl.CostEstimate(
        flops=4 * n_p * dim_p * dff_p,
        transcendentals=0,
        bytes_accessed=(x2d.size * 4                              # x (f32)
                        + n_row_tiles * (w1_p.size * 2 + w2_p.size * 2
                                         + b1_p.size * 4 + b2_p.size * 4)
                        + n_p * dim_p * 4),                       # out (f32)
    )

    # TODO(synk): if an xprof trace shows exposed weight DMA at row-tile
    # boundaries, add pipeline_mode=pl.Buffered(3) on the w1/w2 specs.
    out = pl.pallas_call(
        ffn_kernel,
        out_shape=jax.ShapeDtypeStruct((n_p, dim_p), jnp.float32),
        grid_spec=pltpu.PrefetchScalarGridSpec(
            num_scalar_prefetch=0,
            grid=grid,
            in_specs=[
                pl.BlockSpec((tm, dim_p), lambda i, j: (i, 0)),   # x rows (resident over j)
                pl.BlockSpec((dim_p, tff), lambda i, j: (0, j)),  # w1 slab
                pl.BlockSpec((1, tff), lambda i, j: (0, j)),      # b1 slab
                pl.BlockSpec((tff, dim_p), lambda i, j: (j, 0)),  # w2 slab
                pl.BlockSpec((1, dim_p), lambda i, j: (0, 0)),    # b2
            ],
            out_specs=pl.BlockSpec((tm, dim_p), lambda i, j: (i, 0)),
        ),
        compiler_params=pltpu.CompilerParams(
            dimension_semantics=("parallel", "arbitrary"),
            vmem_limit_bytes=vmem_limit,
        ),
        cost_estimate=cost,
    )(x2d, w1_p, b1_p, w2_p, b2_p)

    return out[:N, :d].reshape(B, S, d)


def positionwise_ffn(x, w1_p, b1_p, w2_p, b2_p):
    """x: [B, S, dim] f32; weights already packed via pack_ffn_weights."""
    tm, tff, vmem_cap, num_cores = _tpu_config()
    return _ffn_call(x, w1_p, b1_p, w2_p, b2_p,
                     tm0=tm, tff0=tff, vmem_cap=vmem_cap, num_cores=num_cores)


def reference_ffn(x, w1, b1, w2, b2):
    h = jnp.maximum(jnp.einsum("bsd,df->bsf", x, w1) + b1, 0.0)
    return jnp.einsum("bsf,fd->bsd", h, w2) + b2


if __name__ == "__main__":
    B, S, dim, dim_ff = 2, 8, 32, 64

    key = jax.random.PRNGKey(0)
    kx, kw1, kb1, kw2, kb2 = jax.random.split(key, 5)

    x = jax.random.normal(kx, (B, S, dim), dtype=jnp.float32)
    # PyTorch Linear default init: U(-1/sqrt(fan_in), 1/sqrt(fan_in)).
    lim1 = 1.0 / (dim ** 0.5)
    lim2 = 1.0 / (dim_ff ** 0.5)
    w1 = jax.random.uniform(kw1, (dim, dim_ff), jnp.float32, -lim1, lim1)   # pre-transposed
    b1 = jax.random.uniform(kb1, (dim_ff,), jnp.float32, -lim1, lim1)
    w2 = jax.random.uniform(kw2, (dim_ff, dim), jnp.float32, -lim2, lim2)   # pre-transposed
    b2 = jax.random.uniform(kb2, (dim,), jnp.float32, -lim2, lim2)

    # Weight pad + bf16 cast done once, off the per-call hot path.
    packed = pack_ffn_weights(w1, b1, w2, b2)

    y = positionwise_ffn(x, *packed)
    jax.block_until_ready(y)

    y_ref = reference_ffn(x, w1, b1, w2, b2)
    assert y.shape == (B, S, dim)
    # bf16 MXU inputs with f32 accumulation -> loosened tolerance vs f32 ref.
    assert jnp.allclose(y, y_ref, atol=5e-2, rtol=5e-2), "mismatch vs reference"

    print("KERNEL_OK")
</pallas_src>

<mosaic_0001>
module attributes {stable_mosaic.version = 11 : i64} {
  func.func @ffn_kernel(%arg0: i32, %arg1: i32, %arg2: memref<16x128xf32, #tpu.memory_space<vmem>>, %arg3: memref<128x128xbf16, #tpu.memory_space<vmem>>, %arg4: memref<1x128xf32, #tpu.memory_space<vmem>>, %arg5: memref<128x128xbf16, #tpu.memory_space<vmem>>, %arg6: memref<1x128xf32, #tpu.memory_space<vmem>>, %arg7: memref<16x128xf32, #tpu.memory_space<vmem>>) attributes {dimension_semantics = [#tpu.dimension_semantics<parallel>, #tpu.dimension_semantics<arbitrary>], iteration_bounds = array<i64: 1, 1>, scalar_prefetch = 0 : i64, scratch_operands = 0 : i64, tpu.core_type = #tpu.core_type<tc>, window_params = [{transform_indices = @transform_0, window_bounds = array<i64: 16, 128>}, {transform_indices = @transform_1, window_bounds = array<i64: 128, 128>}, {transform_indices = @transform_2, window_bounds = array<i64: 1, 128>}, {transform_indices = @transform_3, window_bounds = array<i64: 128, 128>}, {pipeline_mode = #tpu.pipeline_mode<synchronous>, transform_indices = @transform_4, window_bounds = array<i64: 1, 128>}, {transform_indices = @transform_5, window_bounds = array<i64: 16, 128>}]} {
    %c0_i32 = arith.constant 0 : i32
    %0 = arith.cmpi eq, %arg1, %c0_i32 : i32
    %1 = arith.extui %0 : i1 to i32
    %c0_i32_0 = arith.constant 0 : i32
    %2 = arith.cmpi ne, %1, %c0_i32_0 : i32
    scf.if %2 {
      %cst_16 = arith.constant 0.000000e+00 : f32
      %21 = vector.broadcast %cst_16 : f32 to vector<16x128xf32>
      %c0_17 = arith.constant 0 : index
      %c0_18 = arith.constant 0 : index
      %22 = vector.load %arg7[%c0_17, %c0_18] : memref<16x128xf32, #tpu.memory_space<vmem>>, vector<16x128xf32>
      tpu.vector_store %arg7[%c0_17, %c0_18], %21 {strides = array<i32>} : memref<16x128xf32, #tpu.memory_space<vmem>>, vector<16x128xf32>,
    } else {
    }
    %c0 = arith.constant 0 : index
    %c0_1 = arith.constant 0 : index
    %3 = vector.load %arg2[%c0, %c0_1] : memref<16x128xf32, #tpu.memory_space<vmem>>, vector<16x128xf32>
    %4 = arith.truncf %3 : vector<16x128xf32> to vector<16x128xbf16>
    %c0_2 = arith.constant 0 : index
    %c0_3 = arith.constant 0 : index
    %5 = vector.load %arg3[%c0_2, %c0_3] : memref<128x128xbf16, #tpu.memory_space<vmem>>, vector<128x128xbf16>
    %cst = arith.constant dense<0.000000e+00> : vector<16x128xf32>
    %6 = tpu.matmul %4, %5, %cst {dimension_numbers = #tpu.dot_dimension_numbers<[1], [0], [0], [1], [0, 0, 1, 1], [], []>} : vector<16x128xbf16>, vector<128x128xbf16>, vector<16x128xf32> -> vector<16x128xf32>
    %c0_4 = arith.constant 0 : index
    %c0_5 = arith.constant 0 : index
    %7 = vector.load %arg4[%c0_4, %c0_5] : memref<1x128xf32, #tpu.memory_space<vmem>>, vector<1x128xf32>
    %8 = vector.broadcast %7 : vector<1x128xf32> to vector<16x128xf32>
    %9 = arith.addf %6, %8 : vector<16x128xf32>
    %cst_6 = arith.constant 0.000000e+00 : f32
    %10 = vector.broadcast %cst_6 : f32 to vector<16x128xf32>
    %11 = arith.maximumf %9, %10 : vector<16x128xf32>
    %c0_7 = arith.constant 0 : index
    %c0_8 = arith.constant 0 : index
    %12 = vector.load %arg7[%c0_7, %c0_8] : memref<16x128xf32, #tpu.memory_space<vmem>>, vector<16x128xf32>
    %13 = arith.truncf %11 : vector<16x128xf32> to vector<16x128xbf16>
    %c0_9 = arith.constant 0 : index
    %c0_10 = arith.constant 0 : index
    %14 = vector.load %arg5[%c0_9, %c0_10] : memref<128x128xbf16, #tpu.memory_space<vmem>>, vector<128x128xbf16>
    %cst_11 = arith.constant dense<0.000000e+00> : vector<16x128xf32>
    %15 = tpu.matmul %13, %14, %cst_11 {dimension_numbers = #tpu.dot_dimension_numbers<[1], [0], [0], [1], [0, 0, 1, 1], [], []>} : vector<16x128xbf16>, vector<128x128xbf16>, vector<16x128xf32> -> vector<16x128xf32>
    %16 = arith.addf %12, %15 : vector<16x128xf32>
    %c0_12 = arith.constant 0 : index
    %c0_13 = arith.constant 0 : index
    %17 = vector.load %arg7[%c0_12, %c0_13] : memref<16x128xf32, #tpu.memory_space<vmem>>, vector<16x128xf32>
    tpu.vector_store %arg7[%c0_12, %c0_13], %16 {strides = array<i32>} : memref<16x128xf32, #tpu.memory_space<vmem>>, vector<16x128xf32>,
    %c0_i32_14 = arith.constant 0 : i32
    %18 = arith.cmpi eq, %arg1, %c0_i32_14 : i32
    %19 = arith.extui %18 : i1 to i32
    %c0_i32_15 = arith.constant 0 : i32
    %20 = arith.cmpi ne, %19, %c0_i32_15 : i32
    scf.if %20 {
      %c0_16 = arith.constant 0 : index
      %c0_17 = arith.constant 0 : index
      %21 = vector.load %arg7[%c0_16, %c0_17] : memref<16x128xf32, #tpu.memory_space<vmem>>, vector<16x128xf32>
      %c0_18 = arith.constant 0 : index
      %c0_19 = arith.constant 0 : index
      %22 = vector.load %arg6[%c0_18, %c0_19] : memref<1x128xf32, #tpu.memory_space<vmem>>, vector<1x128xf32>
      %23 = vector.broadcast %22 : vector<1x128xf32> to vector<16x128xf32>
      %24 = arith.addf %21, %23 : vector<16x128xf32>
      %c0_20 = arith.constant 0 : index
      %c0_21 = arith.constant 0 : index
      %25 = vector.load %arg7[%c0_20, %c0_21] : memref<16x128xf32, #tpu.memory_space<vmem>>, vector<16x128xf32>
      tpu.vector_store %arg7[%c0_20, %c0_21], %24 {strides = array<i32>} : memref<16x128xf32, #tpu.memory_space<vmem>>, vector<16x128xf32>,
    } else {
    }
    return
  }
  func.func @transform_0(%arg0: i32, %arg1: i32) -> (i32, i32) {
    %c0_i32 = arith.constant 0 : i32
    %c0_i32_0 = arith.constant 0 : i32
    return %arg0, %c0_i32 : i32, i32
  }
  func.func @transform_1(%arg0: i32, %arg1: i32) -> (i32, i32) {
    %c0_i32 = arith.constant 0 : i32
    %c0_i32_0 = arith.constant 0 : i32
    return %c0_i32, %arg1 : i32, i32
  }
  func.func @transform_2(%arg0: i32, %arg1: i32) -> (i32, i32) {
    %c0_i32 = arith.constant 0 : i32
    %c0_i32_0 = arith.constant 0 : i32
    return %c0_i32, %arg1 : i32, i32
  }
  func.func @transform_3(%arg0: i32, %arg1: i32) -> (i32, i32) {
    %c0_i32 = arith.constant 0 : i32
    %c0_i32_0 = arith.constant 0 : i32
    return %arg1, %c0_i32 : i32, i32
  }
  func.func @transform_4(%arg0: i32, %arg1: i32) -> (i32, i32) {
    %c0_i32 = arith.constant 0 : i32
    %c0_i32_0 = arith.constant 0 : i32
    %c0_i32_1 = arith.constant 0 : i32
    return %c0_i32, %c0_i32_0 : i32, i32
  }
  func.func @transform_5(%arg0: i32, %arg1: i32) -> (i32, i32) {
    %c0_i32 = arith.constant 0 : i32
    %c0_i32_0 = arith.constant 0 : i32
    return %arg0, %c0_i32 : i32, i32
  }
}

</mosaic_0001>

<bundles_post_ra>
// kernel: _ffn_call.1
= control target key start
LH: loop header
LB: loop body
LE: loop exit
PB: predicated region body
PF: predicated region fallthrough
CT: control target
= control target key end

     0   :  { %10 = vsyncpa [#allocation3], 0  ;;  %s446_s0 = inlined_call_operand.vmem [shape: f32[16,128], index: 0, kind: input, shape index: {}]   ;;  %s447_s1 = inlined_call_operand.hbm [shape: bf16[128,128], index: 1, kind: input, shape index: {}]   ;;  %s448_s2 = inlined_call_operand.vmem [shape: f32[1,128], index: 2, kind: input, shape index: {}]   ;;  %s449_s3 = inlined_call_operand.hbm [shape: bf16[128,128], index: 3, kind: input, shape index: {}]   ;;  %s450_s4 = inlined_call_operand.vmem [shape: f32[1,128], index: 4, kind: input, shape index: {}]   ;;  %s451_s5 = inlined_call_operand.vmem [shape: f32[16,128], index: 5, kind: output, shape index: {}]  }
   0x1   :  { %s18_s20 = sshll.u32 %s447_s1, 4  ;;  %s19_s20 = int_to_ptr.hbm [resolvable:$true] %s18_s20 }
   0x2   :  { %11 = vsyncpa [#allocation5], 0  ;;  %s388_s21 = smov [#allocation2]   ;;  %s33_s25 = sshll.u32 %s449_s3, 4  ;;  %s34_s25 = int_to_ptr.hbm [resolvable:$true] %s33_s25 }
   0x3   :  { %s20_s22 = sshll.u32 %s388_s21, 4  ;;  %s389_s26 = smov 64   ;;  %s21_s22 = int_to_ptr.vmem [resolvable:$true] %s20_s22 }
   0x4   :  { %s390_s27 = smov 4   ;;  %s391_s28 = smov [#allocation4]  }
   0x5   :  { %26 = dma.hbm_to_vmem [thread:$0]  %s19_s20, 1024, %s21_s22, [#allocation3], %s389_s26, %s389_s26, %s390_s27  }
   0x6   :  { %s35_s29 = sshll.u32 %s391_s28, 4  ;;  %s36_s29 = int_to_ptr.vmem [resolvable:$true] %s35_s29 }
   0x7   :  { %41 = dma.hbm_to_vmem [thread:$0]  %s34_s25, 1024, %s36_s29, [#allocation5], %s389_s26, %s389_s26, %s390_s27  }
   0x8   :  { %384 = dma.done.wait [#allocation3], 1024  }
   0x9   :  { %385 = vsyncadd [#allocation3], 4294966272 }
   0xa   :  { %386 = dma.done.wait [#allocation5], 1024  }
   0xb   :  { %387 = vsyncadd [#allocation5], 4294966272  ;;  %v320_v0 = vld [vmem:[#allocation2 + $0x38] sm:$0xff]  ;;  %v319_v1 = vld [vmem:[#allocation2 + $0x30] sm:$0xff] }
   0xc   :  { %129 = vmatpush.bf16.msra.mxu0 %v320_v0  ;;  %v328_v2 = vld [vmem:[#allocation4 + $0x38] sm:$0xff]  ;;  %v327_v3 = vld [vmem:[#allocation4 + $0x30] sm:$0xff]  ;;  %v318_v4 = vld [vmem:[#allocation2 + $0x28] sm:$0xff] }
   0xd   :  { %212 = vmatpush.bf16.msra.mxu1 %v328_v2  ;;  %v326_v5 = vld [vmem:[#allocation4 + $0x28] sm:$0xff]  ;;  %v317_v6 = vld [vmem:[#allocation2 + $0x20] sm:$0xff]  ;;  %v316_v8 = vld [vmem:[#allocation2 + $0x18] sm:$0xff] }
   0xe   :  { %v325_v7 = vld [vmem:[#allocation4 + $0x20] sm:$0xff]  ;;  %v315_v9 = vld [vmem:[#allocation2 + $0x10] sm:$0xff]  ;;  %v314_v10 = vld [vmem:[#allocation2 + $0x8] sm:$0xff] }
   0xf   :  { %v313_v11 = vld [vmem:[#allocation2] sm:$0xff]  ;;  %v59_v13 = vld [vmem:[%s446_s0 + $0x8] sm:$0xff]  ;;  %v324_v15 = vld [vmem:[#allocation4 + $0x18] sm:$0xff] }
  0x10   :  { %130 = vmatpush.bf16.msra.mxu0 %v319_v1  ;;  %v58_v12 = vld [vmem:[%s446_s0] sm:$0xff]  ;;  %v323_v16 = vld [vmem:[#allocation4 + $0x10] sm:$0xff]  ;;  %v322_v17 = vld [vmem:[#allocation4 + $0x8] sm:$0xff] }
  0x11   :  { %213 = vmatpush.bf16.msra.mxu1 %v327_v3  ;;  %v60_v14 = vpack.c.bf16 %v59_v13, %v58_v12  ;;  %v321_v18 = vld [vmem:[#allocation4] sm:$0xff] }
  0x12   :  { %v334_v20 = vld [vmem:[%s448_s2] ss:$0 sm:$0xff] }
  0x13   :  { %v335_v27 = vld [vmem:[%s450_s4] ss:$0 sm:$0xff] }
  0x14   :  { %131 = vmatpush.bf16.msra.mxu0 %v318_v4 }
  0x15   :  { %214 = vmatpush.bf16.msra.mxu1 %v326_v5 }
  0x18   :  { %132 = vmatpush.bf16.msra.mxu0 %v317_v6 }
  0x19   :  { %215 = vmatpush.bf16.msra.mxu1 %v325_v7 }
  0x1c   :  { %133 = vmatpush.bf16.msra.mxu0 %v316_v8 }
  0x1d   :  { %216 = vmatpush.bf16.msra.mxu1 %v324_v15 }
  0x20   :  { %134 = vmatpush.bf16.msra.mxu0 %v315_v9 }
  0x21   :  { %217 = vmatpush.bf16.msra.mxu1 %v323_v16 }
  0x24   :  { %135 = vmatpush.bf16.msra.mxu0 %v314_v10 }
  0x25   :  { %218 = vmatpush.bf16.msra.mxu1 %v322_v17 }
  0x28   :  { %136 = vmatpush.bf16.msra.mxu0 %v313_v11 }
  0x29   :  { %219 = vmatpush.bf16.msra.mxu1 %v321_v18 }
  0x2b   :  { %137 = vmatmul.bf16.vlgmr.msra.gmra.mxu0 %v60_v14 }
  0xa8   :  { %v138_v19 = vpop.f32.mrf.mxu0 }
  0xa9   :  { %v139_v21 = vadd.f32 %v334_v20, %v138_v19 }
  0xab   :  { %v143_v24 = vmax.f32 %v139_v21, 0.0 }
  0xb0   :  { %v140_v22 = vpop.f32.mrf.mxu0 }
  0xb1   :  { %v141_v23 = vadd.f32 %v334_v20, %v140_v22 }
  0xb3   :  { %v144_v25 = vmax.f32 %v141_v23, 0.0 }
  0xb5   :  { %v147_v26 = vpack.c.bf16 %v144_v25, %v143_v24 }
  0xb7   :  { %220 = vmatmul.bf16.vlgmr.msra.gmra.mxu1 %v147_v26 }
 0x134   :  { %v221_v28 = vpop.f32.mrf.mxu1 }
 0x135   :  { %v239_v29 = vadd.f32 %v335_v27, %v221_v28 }
 0x137   :  { %241 = vst [vmem:[%s451_s5] sm:$0xff] %v239_v29 }
 0x13c   :  { %v223_v30 = vpop.f32.mrf.mxu1 }
 0x13d   :  { %v240_v31 = vadd.f32 %v335_v27, %v223_v30 }
 0x13f   :  { %242 = vst [vmem:[%s451_s5 + $0x8] sm:$0xff] %v240_v31 }
 0x140   :  { %247 = vsyncpa [#allocation3], 1 }
 0x141   :  { %248 = vsyncpa [#allocation5], 1 }

</bundles_post_ra>
